<compile_context>
chip_gen: v7x
topology: tpu7x:2x2x1
jax: 0.10.0
libtpu: 0.0.40
codegen_flags: <defaults>
</compile_context>

<pallas_src>
import functools

import jax
import jax.numpy as jnp
from jax.experimental import pallas as pl
from jax.experimental.pallas import tpu as pltpu

H1, H2 = 400, 300           # hidden widths from the PyTorch module
H1_PAD, H2_PAD = 512, 384   # padded to multiples of 128 (lane-dense MXU tiles)
OUT_PAD = 128               # lane-dense output slab


def _round_up(n, m):
    return ((n + m - 1) // m) * m


@functools.lru_cache(maxsize=1)
def _num_tensorcores():
    """Rough device heuristic: v7x has 2 TensorCores per chip."""
    try:
        kind = jax.devices()[0].device_kind.lower()
        if "v7" in kind:
            return 2
    except Exception:
        pass
    return 1


# ----------------------------------------------------------------------------
# Kernel
# ----------------------------------------------------------------------------
def _actor_kernel(scale_ref, x_ref, w1_ref, b1_ref, w2_ref, b2_ref,
                  w3_ref, b3_ref, o_ref):
    """One (TB, ...) batch tile of the fused 3-layer MLP."""
    scale = scale_ref[0, 0]                       # SMEM scalar
    x = x_ref[...]                                # already bf16 (MXU operand)

    # fc1 + relu   (accumulate f32, elementwise f32)
    h1 = jnp.dot(x, w1_ref[...], preferred_element_type=jnp.float32) + b1_ref[...]
    h1 = jnp.maximum(h1, 0.0)

    # fc2 + relu
    h2 = jnp.dot(h1.astype(jnp.bfloat16), w2_ref[...],
                 preferred_element_type=jnp.float32) + b2_ref[...]
    h2 = jnp.maximum(h2, 0.0)

    # fc3 + scaled tanh (tanh on EUP, f32)
    h3 = jnp.dot(h2.astype(jnp.bfloat16), w3_ref[...],
                 preferred_element_type=jnp.float32) + b3_ref[...]
    o_ref[...] = (scale * jnp.tanh(h3)).astype(o_ref.dtype)


# ----------------------------------------------------------------------------
# One-time parameter preparation (hoisted out of the per-call path)
# ----------------------------------------------------------------------------
def prepare_actor_params(params):
    """Pad weights/biases to dense MXU tiles and cast weights to bf16 ONCE.

    params: dict of unpadded f32 W1 (D,400), b1 (1,400), W2 (400,300),
            b2 (1,300), W3 (300,out), b3 (1,out).
    Returns a dict of device-resident padded arrays plus static dims.
    Zero padding is numerically inert through matmul/relu.
    """
    D = params["W1"].shape[0]
    out_dim = params["W3"].shape[1]
    D_pad = _round_up(D, 8)
    prep = {
        "W1": jnp.pad(params["W1"], ((0, D_pad - D), (0, H1_PAD - H1))).astype(jnp.bfloat16),
        "b1": jnp.pad(params["b1"], ((0, 0), (0, H1_PAD - H1))).astype(jnp.float32),
        "W2": jnp.pad(params["W2"], ((0, H1_PAD - H1), (0, H2_PAD - H2))).astype(jnp.bfloat16),
        "b2": jnp.pad(params["b2"], ((0, 0), (0, H2_PAD - H2))).astype(jnp.float32),
        "W3": jnp.pad(params["W3"], ((0, H2_PAD - H2), (0, OUT_PAD - out_dim))).astype(jnp.bfloat16),
        "b3": jnp.pad(params["b3"], ((0, 0), (0, OUT_PAD - out_dim))).astype(jnp.float32),
        "D": D,
        "D_pad": D_pad,
        "out_dim": out_dim,
    }
    return prep


# ----------------------------------------------------------------------------
# Forward wrapper
# ----------------------------------------------------------------------------
def actor_forward(x, prep, action_scale, *, block_b=512):
    """x: (B, input_dim) float32. prep: output of prepare_actor_params."""
    B, D = x.shape
    assert D == prep["D"], (D, prep["D"])
    D_pad, out_dim = prep["D_pad"], prep["out_dim"]

    # Balanced batch tiling. On v7x (2 TensorCores) force >= 2 grid steps when
    # the batch is large enough so both cores get work; on single-TC chips
    # keep one step (extra steps only add ~0.35 us/step of pipeline overhead).
    min_steps = 2 if (_num_tensorcores() > 1 and B >= 16) else 1
    steps = max(min_steps, pl.cdiv(B, block_b))
    TB = _round_up(pl.cdiv(B, steps), 8)
    steps = pl.cdiv(B, TB)
    B_pad = TB * steps

    # Only the activations are padded/cast per call; bf16 halves x DMA bytes.
    x_pad = jnp.pad(x.astype(jnp.bfloat16), ((0, B_pad - B), (0, D_pad - D)))

    # Scalar action scale in SMEM -> no recompile when the value changes.
    # TODO(synk): a per-action-dim action_scale would be passed as a
    # (1, OUT_PAD) VMEM vector and multiplied in the epilogue instead.
    scale = jnp.asarray(action_scale, jnp.float32).reshape(1, 1)

    const = lambda i: (0, 0)
    resident = pl.Buffered(1)   # grid-invariant -> single-buffer in VMEM
    out = pl.pallas_call(
        _actor_kernel,
        out_shape=jax.ShapeDtypeStruct((B_pad, OUT_PAD), jnp.float32),
        grid=(steps,),
        in_specs=[
            pl.BlockSpec((1, 1), const, memory_space=pltpu.MemorySpace.SMEM),
            pl.BlockSpec((TB, D_pad), lambda i: (i, 0)),                        # x tile (double-buffered)
            pl.BlockSpec((D_pad, H1_PAD), const, pipeline_mode=resident),       # W1 (resident)
            pl.BlockSpec((1, H1_PAD), const, pipeline_mode=resident),           # b1
            pl.BlockSpec((H1_PAD, H2_PAD), const, pipeline_mode=resident),      # W2
            pl.BlockSpec((1, H2_PAD), const, pipeline_mode=resident),           # b2
            pl.BlockSpec((H2_PAD, OUT_PAD), const, pipeline_mode=resident),     # W3
            pl.BlockSpec((1, OUT_PAD), const, pipeline_mode=resident),          # b3
        ],
        out_specs=pl.BlockSpec((TB, OUT_PAD), lambda i: (i, 0)),
        compiler_params=pltpu.CompilerParams(
            dimension_semantics=("parallel",)),
    )(scale, x_pad, prep["W1"], prep["b1"], prep["W2"], prep["b2"],
      prep["W3"], prep["b3"])

    return out[:B, :out_dim]


# ----------------------------------------------------------------------------
# Init / reference
# ----------------------------------------------------------------------------
def init_actor_params(key, input_dim, output_dim):
    """PyTorch nn.Linear default init: U[-1/sqrt(fan_in), 1/sqrt(fan_in)]."""
    def linear(k, fan_in, fan_out):
        kw, kb = jax.random.split(k)
        bound = 1.0 / jnp.sqrt(jnp.float32(fan_in))
        W = jax.random.uniform(kw, (fan_in, fan_out), jnp.float32, -bound, bound)
        b = jax.random.uniform(kb, (1, fan_out), jnp.float32, -bound, bound)
        return W, b

    k1, k2, k3 = jax.random.split(key, 3)
    W1, b1 = linear(k1, input_dim, H1)
    W2, b2 = linear(k2, H1, H2)
    W3, b3 = linear(k3, H2, output_dim)
    return {"W1": W1, "b1": b1, "W2": W2, "b2": b2, "W3": W3, "b3": b3}


def actor_reference(x, params, action_scale, matmul_dtype=jnp.float32):
    """Pure-JAX reference. matmul_dtype=bfloat16 mimics the kernel's MXU path."""
    def dot(a, w):
        return jnp.dot(a.astype(matmul_dtype), w.astype(matmul_dtype),
                       preferred_element_type=jnp.float32)
    h1 = jnp.maximum(dot(x, params["W1"]) + params["b1"], 0.0)
    h2 = jnp.maximum(dot(h1, params["W2"]) + params["b2"], 0.0)
    return action_scale * jnp.tanh(dot(h2, params["W3"]) + params["b3"])


if __name__ == "__main__":
    key = jax.random.PRNGKey(0)
    k_params, k_x = jax.random.split(key)

    batch = 2
    input_dim = 16      # state dimension
    output_dim = 4      # action dimension
    action_scale = 2.0

    params = init_actor_params(k_params, input_dim, output_dim)
    prep = prepare_actor_params(params)           # one-time pad + bf16 cast
    x = jax.random.normal(k_x, (batch, input_dim), jnp.float32)

    out = jax.block_until_ready(actor_forward(x, prep, action_scale))
    assert out.shape == (batch, output_dim)

    # Exact-path check against a bf16-operand reference (same numerics).
    ref_bf16 = actor_reference(x, params, action_scale, matmul_dtype=jnp.bfloat16)
    assert jnp.allclose(out, ref_bf16, atol=2e-3, rtol=2e-3), \
        float(jnp.max(jnp.abs(out - ref_bf16)))

    # Loose sanity check against the full-f32 reference.
    ref_f32 = actor_reference(x, params, action_scale)
    assert jnp.allclose(out, ref_f32, atol=5e-2, rtol=5e-2), \
        float(jnp.max(jnp.abs(out - ref_f32)))

    print("KERNEL_OK")
</pallas_src>

<mosaic_0001>
module attributes {stable_mosaic.version = 11 : i64} {
  func.func @_actor_kernel(%arg0: i32, %arg1: memref<1x1xf32, #tpu.memory_space<smem>>, %arg2: memref<8x16xbf16, #tpu.memory_space<vmem>>, %arg3: memref<16x512xbf16, #tpu.memory_space<vmem>>, %arg4: memref<1x512xf32, #tpu.memory_space<vmem>>, %arg5: memref<512x384xbf16, #tpu.memory_space<vmem>>, %arg6: memref<1x384xf32, #tpu.memory_space<vmem>>, %arg7: memref<384x128xbf16, #tpu.memory_space<vmem>>, %arg8: memref<1x128xf32, #tpu.memory_space<vmem>>, %arg9: memref<8x128xf32, #tpu.memory_space<vmem>>) attributes {dimension_semantics = [#tpu.dimension_semantics<parallel>], iteration_bounds = array<i64: 1>, scalar_prefetch = 0 : i64, scratch_operands = 0 : i64, tpu.core_type = #tpu.core_type<tc>, window_params = [{transform_indices = @transform_0, window_bounds = array<i64: 1, 1>}, {transform_indices = @transform_1, window_bounds = array<i64: 8, 16>}, {pipeline_mode = #tpu.pipeline_mode<synchronous>, transform_indices = @transform_2, window_bounds = array<i64: 16, 512>}, {pipeline_mode = #tpu.pipeline_mode<synchronous>, transform_indices = @transform_3, window_bounds = array<i64: 1, 512>}, {pipeline_mode = #tpu.pipeline_mode<synchronous>, transform_indices = @transform_4, window_bounds = array<i64: 512, 384>}, {pipeline_mode = #tpu.pipeline_mode<synchronous>, transform_indices = @transform_5, window_bounds = array<i64: 1, 384>}, {pipeline_mode = #tpu.pipeline_mode<synchronous>, transform_indices = @transform_6, window_bounds = array<i64: 384, 128>}, {pipeline_mode = #tpu.pipeline_mode<synchronous>, transform_indices = @transform_7, window_bounds = array<i64: 1, 128>}, {transform_indices = @transform_8, window_bounds = array<i64: 8, 128>}]} {
    %c0 = arith.constant 0 : index
    %c0_0 = arith.constant 0 : index
    %0 = memref.load %arg1[%c0, %c0_0] : memref<1x1xf32, #tpu.memory_space<smem>>
    %c0_1 = arith.constant 0 : index
    %c0_2 = arith.constant 0 : index
    %1 = vector.load %arg2[%c0_1, %c0_2] : memref<8x16xbf16, #tpu.memory_space<vmem>>, vector<8x16xbf16>
    %c0_3 = arith.constant 0 : index
    %c0_4 = arith.constant 0 : index
    %2 = vector.load %arg3[%c0_3, %c0_4] : memref<16x512xbf16, #tpu.memory_space<vmem>>, vector<16x512xbf16>
    %cst = arith.constant dense<0.000000e+00> : vector<8x512xf32>
    %3 = tpu.matmul %1, %2, %cst {dimension_numbers = #tpu.dot_dimension_numbers<[1], [0], [0], [1], [0, 0, 1, 1], [], []>} : vector<8x16xbf16>, vector<16x512xbf16>, vector<8x512xf32> -> vector<8x512xf32>
    %c0_5 = arith.constant 0 : index
    %c0_6 = arith.constant 0 : index
    %4 = vector.load %arg4[%c0_5, %c0_6] : memref<1x512xf32, #tpu.memory_space<vmem>>, vector<1x512xf32>
    %5 = vector.broadcast %4 : vector<1x512xf32> to vector<8x512xf32>
    %6 = arith.addf %3, %5 : vector<8x512xf32>
    %cst_7 = arith.constant 0.000000e+00 : f32
    %7 = vector.broadcast %cst_7 : f32 to vector<8x512xf32>
    %8 = arith.maximumf %6, %7 : vector<8x512xf32>
    %9 = arith.truncf %8 : vector<8x512xf32> to vector<8x512xbf16>
    %c0_8 = arith.constant 0 : index
    %c0_9 = arith.constant 0 : index
    %10 = vector.load %arg5[%c0_8, %c0_9] : memref<512x384xbf16, #tpu.memory_space<vmem>>, vector<512x384xbf16>
    %cst_10 = arith.constant dense<0.000000e+00> : vector<8x384xf32>
    %11 = tpu.matmul %9, %10, %cst_10 {dimension_numbers = #tpu.dot_dimension_numbers<[1], [0], [0], [1], [0, 0, 1, 1], [], []>} : vector<8x512xbf16>, vector<512x384xbf16>, vector<8x384xf32> -> vector<8x384xf32>
    %c0_11 = arith.constant 0 : index
    %c0_12 = arith.constant 0 : index
    %12 = vector.load %arg6[%c0_11, %c0_12] : memref<1x384xf32, #tpu.memory_space<vmem>>, vector<1x384xf32>
    %13 = vector.broadcast %12 : vector<1x384xf32> to vector<8x384xf32>
    %14 = arith.addf %11, %13 : vector<8x384xf32>
    %cst_13 = arith.constant 0.000000e+00 : f32
    %15 = vector.broadcast %cst_13 : f32 to vector<8x384xf32>
    %16 = arith.maximumf %14, %15 : vector<8x384xf32>
    %17 = arith.truncf %16 : vector<8x384xf32> to vector<8x384xbf16>
    %c0_14 = arith.constant 0 : index
    %c0_15 = arith.constant 0 : index
    %18 = vector.load %arg7[%c0_14, %c0_15] : memref<384x128xbf16, #tpu.memory_space<vmem>>, vector<384x128xbf16>
    %cst_16 = arith.constant dense<0.000000e+00> : vector<8x128xf32>
    %19 = tpu.matmul %17, %18, %cst_16 {dimension_numbers = #tpu.dot_dimension_numbers<[1], [0], [0], [1], [0, 0, 1, 1], [], []>} : vector<8x384xbf16>, vector<384x128xbf16>, vector<8x128xf32> -> vector<8x128xf32>
    %c0_17 = arith.constant 0 : index
    %c0_18 = arith.constant 0 : index
    %20 = vector.load %arg8[%c0_17, %c0_18] : memref<1x128xf32, #tpu.memory_space<vmem>>, vector<1x128xf32>
    %21 = vector.broadcast %20 : vector<1x128xf32> to vector<8x128xf32>
    %22 = arith.addf %19, %21 : vector<8x128xf32>
    %23 = math.tanh %22 : vector<8x128xf32>
    %24 = vector.broadcast %0 : f32 to vector<8x128xf32>
    %25 = arith.mulf %24, %23 : vector<8x128xf32>
    %c0_19 = arith.constant 0 : index
    %c0_20 = arith.constant 0 : index
    %26 = vector.load %arg9[%c0_19, %c0_20] : memref<8x128xf32, #tpu.memory_space<vmem>>, vector<8x128xf32>
    tpu.vector_store %arg9[%c0_19, %c0_20], %25 {strides = array<i32>} : memref<8x128xf32, #tpu.memory_space<vmem>>, vector<8x128xf32>,
    return
  }
  func.func @transform_0(%arg0: i32) -> (i32, i32) {
    %c0_i32 = arith.constant 0 : i32
    %c0_i32_0 = arith.constant 0 : i32
    %c0_i32_1 = arith.constant 0 : i32
    return %c0_i32, %c0_i32_0 : i32, i32
  }
  func.func @transform_1(%arg0: i32) -> (i32, i32) {
    %c0_i32 = arith.constant 0 : i32
    %c0_i32_0 = arith.constant 0 : i32
    return %arg0, %c0_i32 : i32, i32
  }
  func.func @transform_2(%arg0: i32) -> (i32, i32) {
    %c0_i32 = arith.constant 0 : i32
    %c0_i32_0 = arith.constant 0 : i32
    %c0_i32_1 = arith.constant 0 : i32
    return %c0_i32, %c0_i32_0 : i32, i32
  }
  func.func @transform_3(%arg0: i32) -> (i32, i32) {
    %c0_i32 = arith.constant 0 : i32
    %c0_i32_0 = arith.constant 0 : i32
    %c0_i32_1 = arith.constant 0 : i32
    return %c0_i32, %c0_i32_0 : i32, i32
  }
  func.func @transform_4(%arg0: i32) -> (i32, i32) {
    %c0_i32 = arith.constant 0 : i32
    %c0_i32_0 = arith.constant 0 : i32
    %c0_i32_1 = arith.constant 0 : i32
    return %c0_i32, %c0_i32_0 : i32, i32
  }
  func.func @transform_5(%arg0: i32) -> (i32, i32) {
    %c0_i32 = arith.constant 0 : i32
    %c0_i32_0 = arith.constant 0 : i32
    %c0_i32_1 = arith.constant 0 : i32
    return %c0_i32, %c0_i32_0 : i32, i32
  }
  func.func @transform_6(%arg0: i32) -> (i32, i32) {
    %c0_i32 = arith.constant 0 : i32
    %c0_i32_0 = arith.constant 0 : i32
    %c0_i32_1 = arith.constant 0 : i32
    return %c0_i32, %c0_i32_0 : i32, i32
  }
  func.func @transform_7(%arg0: i32) -> (i32, i32) {
    %c0_i32 = arith.constant 0 : i32
    %c0_i32_0 = arith.constant 0 : i32
    %c0_i32_1 = arith.constant 0 : i32
    return %c0_i32, %c0_i32_0 : i32, i32
  }
  func.func @transform_8(%arg0: i32) -> (i32, i32) {
    %c0_i32 = arith.constant 0 : i32
    %c0_i32_0 = arith.constant 0 : i32
    return %arg0, %c0_i32 : i32, i32
  }
}

</mosaic_0001>

<bundles_post_ra>
// kernel: tpu_custom_call.1
= control target key start
LH: loop header
LB: loop body
LE: loop exit
PB: predicated region body
PF: predicated region fallthrough
CT: control target
= control target key end

     0   :  { %14 = vsyncpa [#allocation4], 0  ;;  %s2030_s0 = inlined_call_operand.<no memory space> [shape: f32[1,1], index: 0, kind: input, shape index: {}]   ;;  %s2031_s1 = inlined_call_operand.hbm [shape: bf16[8,16], index: 1, kind: input, shape index: {}]   ;;  %s2032_s2 = inlined_call_operand.hbm [shape: bf16[16,512], index: 2, kind: input, shape index: {}]   ;;  %s2033_s3 = inlined_call_operand.vmem [shape: f32[1,512], index: 3, kind: input, shape index: {}]   ;;  %s2034_s4 = inlined_call_operand.hbm [shape: bf16[512,384], index: 4, kind: input, shape index: {}]   ;;  %s2035_s5 = inlined_call_operand.vmem [shape: f32[1,384], index: 5, kind: input, shape index: {}]   ;;  %s2036_s6 = inlined_call_operand.hbm [shape: bf16[384,128], index: 6, kind: input, shape index: {}]   ;;  %s2037_s7 = inlined_call_operand.vmem [shape: f32[1,128], index: 7, kind: input, shape index: {}]   ;;  %s2038_s8 = inlined_call_operand.hbm [shape: f32[8,128], index: 8, kind: output, shape index: {}]  }
   0x1   :  { %15 = vsyncpa [#allocation7], 0 }
   0x2   :  { %16 = vsyncpa [#allocation10], 0 }
   0x3   :  { %17 = vsyncpa [#allocation5], 0  ;;  %s1872_s27 = smov [#allocation6]   ;;  %s1754_s9 = scalar_lea.hbm %s2032_s2, 512 }
   0x4   :  { %s35_s28 = sshll.u32 %s1872_s27, 4  ;;  %p1755_p0 = scmp.ne.s32.totalorder %s2032_s2, %s1754_s9  ;;  %s36_s28 = int_to_ptr.vmem [resolvable:$true] %s35_s28 }
   0x5   :  { %p1758_p1 = scmp.lt.u32.totalorder %s1754_s9, %s2032_s2 }
   0x7   :  { %p1760_p2 = pnand %p1758_p1, %p1755_p0 }
   0x9   :  { %1763 = shalt.err (!%p1760_p2)
}
   0xa   :  { %s1764_s14 = scalar_lea.vmem %s36_s28, 512  ;;  %p1769_p4 = scmp.lt.s32.totalorder %s36_s28, %s36_s28 }
   0xb   :  { %p1765_p3 = scmp.ne.s32.totalorder %s36_s28, %s1764_s14  ;;  %p1770_p5 = scmp.lt.s32.totalorder %s1764_s14, %s1764_s14 }
   0xd   :  { %p1771_p6 = por %p1770_p5, %p1769_p4 }
   0xf   :  { %p1772_p7 = pnand %p1771_p6, %p1765_p3 }
  0x11   :  { %1775 = shalt.err (!%p1772_p7)
}
  0x12   :  { %s1873_s15 = smov 256   ;;  %s1874_s16 = smov 16  }
  0x13   :  { %41 = dma.hbm_to_vmem [thread:$0]  %s2032_s2, 512, %s36_s28, [#allocation7], %s1873_s15, %s1873_s15, %s1874_s16  }
  0x14   :  { %s1875_s19 = smov [#allocation3]   ;;  %s1876_s21 = smov [#allocation8]  }
  0x15   :  { %s26_s20 = sshll.u32 %s1875_s19, 4  ;;  %s49_s22 = sshll.u32 %s1876_s21, 4  ;;  %s27_s20 = int_to_ptr.vmem [resolvable:$true] %s26_s20  ;;  %s50_s22 = int_to_ptr.vmem [resolvable:$true] %s49_s22 }
  0x16   :  { %s1776_s25 = scalar_lea.hbm %s2031_s1, 64 }
  0x17   :  { %p1777_p8 = scmp.ne.s32.totalorder %s2031_s1, %s1776_s25  ;;  %p1780_p9 = scmp.lt.u32.totalorder %s1776_s25, %s2031_s1 }
  0x19   :  { %p1782_p10 = pnand %p1780_p9, %p1777_p8 }
  0x1b   :  { %1785 = shalt.err (!%p1782_p10)
}
  0x1c   :  { %s1786_s2 = scalar_lea.vmem %s27_s20, 64  ;;  %p1791_p12 = scmp.lt.s32.totalorder %s27_s20, %s27_s20 }
  0x1d   :  { %p1787_p11 = scmp.ne.s32.totalorder %s27_s20, %s1786_s2  ;;  %p1792_p13 = scmp.lt.s32.totalorder %s1786_s2, %s1786_s2 }
  0x1f   :  { %p1793_p0 = por %p1792_p13, %p1791_p12 }
  0x21   :  { %p1794_p1 = pnand %p1793_p0, %p1787_p11 }
  0x23   :  { %1797 = shalt.err (!%p1794_p1)
}
  0x24   :  { %29 = dma.hbm_to_vmem [thread:$0]  %s2031_s1, 64, %s27_s20, [#allocation4]  }
  0x25   :  { %s1798_s12 = scalar_lea.hbm %s2034_s4, 12288 }
  0x26   :  { %p1799_p2 = scmp.ne.s32.totalorder %s2034_s4, %s1798_s12  ;;  %p1802_p3 = scmp.lt.u32.totalorder %s1798_s12, %s2034_s4 }
  0x28   :  { %p1804_p4 = pnand %p1802_p3, %p1799_p2 }
  0x2a   :  { %1807 = shalt.err (!%p1804_p4)
}
  0x2b   :  { %s1808_s17 = scalar_lea.vmem %s50_s22, 12288  ;;  %p1813_p6 = scmp.lt.s32.totalorder %s50_s22, %s50_s22 }
  0x2c   :  { %p1809_p5 = scmp.ne.s32.totalorder %s50_s22, %s1808_s17  ;;  %p1814_p7 = scmp.lt.s32.totalorder %s1808_s17, %s1808_s17 }
  0x2e   :  { %p1815_p8 = por %p1814_p7, %p1813_p6 }
  0x30   :  { %p1816_p9 = pnand %p1815_p8, %p1809_p5 }
  0x32   :  { %1819 = shalt.err (!%p1816_p9)
}
  0x33   :  { %s1877_s1 = smov 192   ;;  %s1878_s18 = smov 12  }
  0x34   :  { %55 = dma.hbm_to_vmem [thread:$0]  %s2034_s4, 12288, %s50_s22, [#allocation7], %s1877_s1, %s1877_s1, %s1878_s18  }
  0x35   :  { %s1879_s21 = smov [#allocation9]   ;;  %s1820_s26 = scalar_lea.hbm %s2036_s6, 3072 }
  0x36   :  { %s63_s23 = sshll.u32 %s1879_s21, 4  ;;  %p1821_p10 = scmp.ne.s32.totalorder %s2036_s6, %s1820_s26  ;;  %s64_s23 = int_to_ptr.vmem [resolvable:$true] %s63_s23 }
  0x37   :  { %p1824_p11 = scmp.lt.u32.totalorder %s1820_s26, %s2036_s6 }
  0x39   :  { %p1826_p12 = pnand %p1824_p11, %p1821_p10 }
  0x3b   :  { %1829 = shalt.err (!%p1826_p12)
}
  0x3c   :  { %s1830_s28 = scalar_lea.vmem %s64_s23, 3072  ;;  %p1835_p0 = scmp.lt.s32.totalorder %s64_s23, %s64_s23 }
  0x3d   :  { %p1831_p13 = scmp.ne.s32.totalorder %s64_s23, %s1830_s28  ;;  %p1836_p1 = scmp.lt.s32.totalorder %s1830_s28, %s1830_s28 }
  0x3f   :  { %p1837_p2 = por %p1836_p1, %p1835_p0 }
  0x41   :  { %p1838_p3 = pnand %p1837_p2, %p1831_p13 }
  0x43   :  { %1841 = shalt.err (!%p1838_p3)
}
  0x44   :  { %s1880_s4 = smov 64   ;;  %s1881_s22 = smov 4  }
  0x45   :  { %69 = dma.hbm_to_vmem [thread:$0]  %s2036_s6, 3072, %s64_s23, [#allocation10], %s1880_s4, %s1880_s4, %s1881_s22  }
  0x46   :  { %1864 = dma.done.wait [#allocation4], 64  }
  0x47   :  { %1865 = vsyncadd [#allocation4], 4294967232 }
  0x48   :  { %1866 = dma.done.wait [#allocation7], 12800  }
  0x49   :  { %1867 = vsyncadd [#allocation7], 4294954496 }
  0x4a   :  { %1868 = dma.done.wait [#allocation10], 3072  }
  0x4b   :  { %1869 = vsyncadd [#allocation10], 4294964224  ;;  %v1882_v0 = vmov 0   ;;  %v1594_v1 = vld [vmem:[#allocation6 + $0x4] ss:$16 sps:$4 sm:$0xff]   ;;  %vm133_vm0 = vcmask 130048   ;;  %v93_v56 = vlaneseq }
  0x4c   :  { %169 = vmatprep.mubr.bf16.mxu0 %v1882_v0  ;;  %210 = vmatprep.mubr.bf16.mxu1 %v1882_v0  ;;  %v1596_v2 = vld [vmem:[#allocation6] ss:$16 sps:$4 sm:$0xff]   ;;  %v86_v3 = vld [vmem:[#allocation3] sm:$0xf]  ;;  %v1599_v5 = vld [vmem:[#allocation6 + $0x8] ss:$16 sps:$4 sm:$0xff]  }
  0x4d   :  { %137 = vmatprep.subr.bf16.mxu0 %v1594_v1  ;;  %v1597_v4 = vld [vmem:[#allocation6 + $0xc] ss:$16 sps:$4 sm:$0xff]   ;;  %v1602_v7 = vld [vmem:[#allocation8 + $0x4] ss:$12 sps:$4 sm:$0xff]   ;;  %v1608_v10 = vld [vmem:[#allocation8 + $0x34] ss:$12 sps:$4 sm:$0xff]  }
  0x4e   :  { %138 = vmatpush1.bf16.msra.mxu0 %v1596_v2  ;;  %v1600_v6 = vld [vmem:[#allocation8] ss:$12 sps:$4 sm:$0xff]   ;;  %178 = vmatprep.subr.bf16.mxu1 %v1597_v4  ;;  %v1605_v8 = vld [vmem:[#allocation8 + $0x1c] ss:$12 sps:$4 sm:$0xff]   ;;  %v1603_v9 = vld [vmem:[#allocation8 + $0x18] ss:$12 sps:$4 sm:$0xff]  }
  0x4f   :  { %179 = vmatpush1.bf16.msra.mxu1 %v1599_v5  ;;  %884 = vmatprep.subr.bf16.mxu0 %v1602_v7  ;;  %v1606_v11 = vld [vmem:[#allocation8 + $0x30] ss:$12 sps:$4 sm:$0xff]   ;;  %v1611_v12 = vld [vmem:[#allocation8 + $0x4c] ss:$12 sps:$4 sm:$0xff]   ;;  %v1609_v13 = vld [vmem:[#allocation8 + $0x48] ss:$12 sps:$4 sm:$0xff]  }
  0x50   :  { %v1614_v14 = vld [vmem:[#allocation8 + $0x64] ss:$12 sps:$4 sm:$0xff]   ;;  %v1627_v15 = vld [vmem:[#allocation8 + $0xc8] ss:$12 sps:$4 sm:$0xff]   ;;  %v1612_v17 = vld [vmem:[#allocation8 + $0x60] ss:$12 sps:$4 sm:$0xff]  }
  0x51   :  { %1356 = vmatmul.mubr.msk.bf16.vlgmr.msra.gmra.mrb[0].mxu0 %vm133_vm0, %v86_v3  ;;  %v1628_v16 = vld [vmem:[#allocation8 + $0x8] ss:$12 sps:$4 sm:$0xff]   ;;  %1479 = vmatprep.subr.bf16.mxu1 %v1627_v15  ;;  %v1632_v19 = vld [vmem:[#allocation8 + $0xe0] ss:$12 sps:$4 sm:$0xff]   ;;  %v1615_v21 = vld [vmem:[#allocation8 + $0x78] ss:$12 sps:$4 sm:$0xff]  }
  0x52   :  { %885 = vmatpush1.bf16.msra.mxu0 %v1600_v6  ;;  %1357 = vmatmul.mubr.msk.bf16.vlgmr.msra.gmra.mrb[0].mxu1 %vm133_vm0, %v86_v3  ;;  %v1617_v18 = vld [vmem:[#allocation8 + $0x7c] ss:$12 sps:$4 sm:$0xff]   ;;  %v1633_v20 = vld [vmem:[#allocation8 + $0x20] ss:$12 sps:$4 sm:$0xff]   ;;  %v1637_v22 = vld [vmem:[#allocation8 + $0xf8] ss:$12 sps:$4 sm:$0xff]  }
  0x53   :  { %886 = vmatprep.subr.bf16.mxu0 %v1605_v8  ;;  %1480 = vmatpush3.bf16.msra.mxu1 %v1628_v16  ;;  %v1638_v23 = vld [vmem:[#allocation8 + $0x38] ss:$12 sps:$4 sm:$0xff]   ;;  %v1620_v24 = vld [vmem:[#allocation8 + $0x94] ss:$12 sps:$4 sm:$0xff]   ;;  %v1642_v25 = vld [vmem:[#allocation8 + $0x110] ss:$12 sps:$4 sm:$0xff]  }
  0x54   :  { %1481 = vmatprep.subr.bf16.mxu1 %v1632_v19  ;;  %v1643_v26 = vld [vmem:[#allocation8 + $0x50] ss:$12 sps:$4 sm:$0xff]   ;;  %v1623_v28 = vld [vmem:[#allocation8 + $0xac] ss:$12 sps:$4 sm:$0xff]   ;;  %v1647_v29 = vld [vmem:[#allocation8 + $0x128] ss:$12 sps:$4 sm:$0xff]  }
  0x55   :  { %v1618_v27 = vld [vmem:[#allocation8 + $0x90] ss:$12 sps:$4 sm:$0xff]   ;;  %v1648_v30 = vld [vmem:[#allocation8 + $0x68] ss:$12 sps:$4 sm:$0xff]   ;;  %v1652_v33 = vld [vmem:[#allocation8 + $0x140] ss:$12 sps:$4 sm:$0xff]  }
  0x56   :  { %887 = vmatpush1.bf16.msra.mxu0 %v1603_v9  ;;  %v1621_v31 = vld [vmem:[#allocation8 + $0xa8] ss:$12 sps:$4 sm:$0xff]   ;;  %v1626_v32 = vld [vmem:[#allocation8 + $0xc4] ss:$12 sps:$4 sm:$0xff]   ;;  %v1624_v34 = vld [vmem:[#allocation8 + $0xc0] ss:$12 sps:$4 sm:$0xff]  }
  0x57   :  { %888 = vmatprep.subr.bf16.mxu0 %v1608_v10  ;;  %1482 = vmatpush3.bf16.msra.mxu1 %v1633_v20  ;;  %v1653_v35 = vld [vmem:[#allocation8 + $0x80] ss:$12 sps:$4 sm:$0xff]   ;;  %v1631_v36 = vld [vmem:[#allocation8 + $0xdc] ss:$12 sps:$4 sm:$0xff]   ;;  %v1629_v37 = vld [vmem:[#allocation8 + $0xd8] ss:$12 sps:$4 sm:$0xff]  }
  0x58   :  { %1483 = vmatprep.subr.bf16.mxu1 %v1637_v22  ;;  %v1636_v38 = vld [vmem:[#allocation8 + $0xf4] ss:$12 sps:$4 sm:$0xff]   ;;  %v1634_v39 = vld [vmem:[#allocation8 + $0xf0] ss:$12 sps:$4 sm:$0xff]   ;;  %v1641_v40 = vld [vmem:[#allocation8 + $0x10c] ss:$12 sps:$4 sm:$0xff]  }
  0x59   :  { %v1639_v41 = vld [vmem:[#allocation8 + $0x108] ss:$12 sps:$4 sm:$0xff]   ;;  %v1646_v42 = vld [vmem:[#allocation8 + $0x124] ss:$12 sps:$4 sm:$0xff]   ;;  %v1644_v43 = vld [vmem:[#allocation8 + $0x120] ss:$12 sps:$4 sm:$0xff]  }
  0x5a   :  { %889 = vmatpush1.bf16.msra.mxu0 %v1606_v11  ;;  %v1651_v44 = vld [vmem:[#allocation8 + $0x13c] ss:$12 sps:$4 sm:$0xff]   ;;  %v1649_v45 = vld [vmem:[#allocation8 + $0x138] ss:$12 sps:$4 sm:$0xff]   ;;  %v1656_v46 = vld [vmem:[#allocation8 + $0x154] ss:$12 sps:$4 sm:$0xff]  }
  0x5b   :  { %890 = vmatprep.subr.bf16.mxu0 %v1611_v12  ;;  %1484 = vmatpush3.bf16.msra.mxu1 %v1638_v23  ;;  %v1657_v47 = vld [vmem:[#allocation8 + $0x158] ss:$12 sps:$4 sm:$0xff]   ;;  %v1654_v48 = vld [vmem:[#allocation8 + $0x150] ss:$12 sps:$4 sm:$0xff]   ;;  %v1659_v52 = vld [vmem:[#allocation8 + $0x168] ss:$12 sps:$4 sm:$0xff]  }
  0x5c   :  { %1485 = vmatprep.subr.bf16.mxu1 %v1642_v25  ;;  %v1658_v49 = vld [vmem:[#allocation8 + $0x98] ss:$12 sps:$4 sm:$0xff]   ;;  %v1662_v51 = vld [vmem:[#allocation8 + $0x170] ss:$12 sps:$4 sm:$0xff]   ;;  %v1667_v55 = vld [vmem:[#allocation8 + $0x248] ss:$12 sps:$4 sm:$0xff]  }
  0x5d   :  { %v1661_v50 = vld [vmem:[#allocation8 + $0x16c] ss:$12 sps:$4 sm:$0xff]   ;;  %v1663_v53 = vld [vmem:[#allocation8 + $0xb0] ss:$12 sps:$4 sm:$0xff]   ;;  %v1979_v57 = vshrl.u32 %v93_v56, 7  ;;  %vm1884_vm1 = vmmov 0  }
  0x5e   :  { %891 = vmatpush1.bf16.msra.mxu0 %v1609_v13  ;;  %v1666_v54 = vld [vmem:[#allocation8 + $0x184] ss:$12 sps:$4 sm:$0xff]   ;;  %v1985_v59 = vld [vmem:[%s2033_s3] sm:$0xf]  ;;  %v1664_v15 = vld [vmem:[#allocation8 + $0x180] ss:$12 sps:$4 sm:$0xff]  }
  0x5f   :  { %892 = vmatprep.subr.bf16.mxu0 %v1614_v14  ;;  %1486 = vmatpush3.bf16.msra.mxu1 %v1643_v26  ;;  %v95_v58 = vsub.s32 0, %v1979_v57  ;;  %v99_v60 = vsub.s32 1, %v1979_v57  ;;  %v107_v61 = vsub.s32 3, %v1979_v57  ;;  %v1668_v16 = vld [vmem:[#allocation8 + $0x188] ss:$12 sps:$4 sm:$0xff]   ;;  %s1885_s16 = smov [#allocation11]  }
  0x60   :  { %1487 = vmatprep.subr.bf16.mxu1 %v1647_v29  ;;  %v1671_v19 = vld [vmem:[#allocation8 + $0x19c] ss:$12 sps:$4 sm:$0xff]   ;;  %v1672_v20 = vld [vmem:[#allocation8 + $0x260] ss:$12 sps:$4 sm:$0xff]   ;;  %v1669_v22 = vld [vmem:[#allocation8 + $0x198] ss:$12 sps:$4 sm:$0xff]  }
  0x61   :  { %v96_v62 = vrot.slane %v1985_v59, %v95_v58  ;;  %v100_v63 = vrot.slane %v1985_v59, %v99_v60  ;;  %v108_v1 = vrot.slane %v1985_v59, %v107_v61  ;;  %v1673_v23 = vld [vmem:[#allocation8 + $0x1a0] ss:$12 sps:$4 sm:$0xff]   ;;  %v1677_v25 = vld [vmem:[#allocation8 + $0x278] ss:$12 sps:$4 sm:$0xff]   ;;  %v1674_v26 = vld [vmem:[#allocation8 + $0x1b0] ss:$12 sps:$4 sm:$0xff]  }
  0x62   :  { %893 = vmatpush1.bf16.msra.mxu0 %v1612_v17  ;;  %v1682_v29 = vld [vmem:[#allocation8 + $0x290] ss:$12 sps:$4 sm:$0xff]   ;;  %v1707_v56 = vld [vmem:[#allocation8 + $0x258] ss:$12 sps:$4 sm:$0xff]   ;;  %s1341_s17 = sshll.u32 %s1885_s16, 4  ;;  %s1342_s17 = int_to_ptr.vmem [resolvable:$true] %s1341_s17 }
  0x63   :  { %894 = vmatprep.subr.bf16.mxu0 %v1617_v18  ;;  %1488 = vmatpush3.bf16.msra.mxu1 %v1648_v30  ;;  %v1679_v30 = vld [vmem:[#allocation8 + $0x1c8] ss:$12 sps:$4 sm:$0xff]   ;;  %v1710_v61 = vld [vmem:[#allocation8 + $0x270] ss:$12 sps:$4 sm:$0xff]   ;;  %s1842_s1 = scalar_lea.vmem %s1342_s17, 128  ;;  %p1847_p5 = scmp.lt.s32.totalorder %s1342_s17, %s1342_s17 }
  0x64   :  { %1489 = vmatprep.subr.bf16.mxu1 %v1652_v33  ;;  %v1687_v33 = vld [vmem:[#allocation8 + $0x2a8] ss:$12 sps:$4 sm:$0xff]   ;;  %p1843_p4 = scmp.ne.s32.totalorder %s1342_s17, %s1842_s1  ;;  %p1848_p6 = scmp.lt.s32.totalorder %s1842_s1, %s1842_s1 }
  0x66   :  { %895 = vmatpush1.bf16.msra.mxu0 %v1615_v21  ;;  %p1849_p7 = por %p1848_p6, %p1847_p5 }
  0x67   :  { %896 = vmatprep.subr.bf16.mxu0 %v1620_v24  ;;  %1490 = vmatpush3.bf16.msra.mxu1 %v1653_v35  ;;  %v1676_v24 = vld [vmem:[#allocation8 + $0x1b4] ss:$12 sps:$4 sm:$0xff]  }
  0x68   :  { %1491 = vmatprep.subr.bf16.mxu1 %v1657_v47  ;;  %v1684_v35 = vld [vmem:[#allocation8 + $0x1e0] ss:$12 sps:$4 sm:$0xff]   ;;  %p1850_p8 = pnand %p1849_p7, %p1843_p4 }
  0x69   :  { %v1701_v47 = vld [vmem:[#allocation8 + $0x22c] ss:$12 sps:$4 sm:$0xff]  }
  0x6a   :  { %897 = vmatpush1.bf16.msra.mxu0 %v1618_v27  ;;  %v1678_v27 = vld [vmem:[#allocation8 + $0x1b8] ss:$12 sps:$4 sm:$0xff]  }
  0x6b   :  { %898 = vmatprep.subr.bf16.mxu0 %v1623_v28  ;;  %1492 = vmatpush3.bf16.msra.mxu1 %v1658_v49  ;;  %v1681_v28 = vld [vmem:[#allocation8 + $0x1cc] ss:$12 sps:$4 sm:$0xff]  }
  0x6c   :  { %1493 = vmatprep.subr.bf16.mxu1 %v1662_v51  ;;  %v1703_v51 = vld [vmem:[#allocation8 + $0x230] ss:$12 sps:$4 sm:$0xff]  }
  0x6e   :  { %899 = vmatpush1.bf16.msra.mxu0 %v1621_v31  ;;  %v1683_v31 = vld [vmem:[#allocation8 + $0x1d0] ss:$12 sps:$4 sm:$0xff]  }
  0x6f   :  { %900 = vmatprep.subr.bf16.mxu0 %v1626_v32  ;;  %1494 = vmatpush3.bf16.msra.mxu1 %v1663_v53  ;;  %v1686_v32 = vld [vmem:[#allocation8 + $0x1e4] ss:$12 sps:$4 sm:$0xff]  }
  0x70   :  { %1501 = vmatprep.subr.bf16.mxu1 %v1667_v55  ;;  %v1709_v55 = vld [vmem:[#allocation8 + $0x25c] ss:$12 sps:$4 sm:$0xff]  }
  0x72   :  { %901 = vmatpush1.bf16.msra.mxu0 %v1624_v34  ;;  %v103_v34 = vsub.s32 2, %v1979_v57  ;;  %v1746_v57 = vld [vmem:[#allocation9 + $0x90] sm:$0xff]  }
  0x73   :  { %902 = vmatprep.subr.bf16.mxu0 %v1631_v36  ;;  %v1688_v36 = vld [vmem:[#allocation8 + $0x1e8] ss:$12 sps:$4 sm:$0xff]  }
  0x76   :  { %903 = vmatpush1.bf16.msra.mxu0 %v1629_v37  ;;  %v1691_v37 = vld [vmem:[#allocation8 + $0x1fc] ss:$12 sps:$4 sm:$0xff]  }
  0x77   :  { %904 = vmatprep.subr.bf16.mxu0 %v1636_v38  ;;  %v1692_v38 = vld [vmem:[#allocation8 + $0x2c0] ss:$12 sps:$4 sm:$0xff]  }
  0x7a   :  { %905 = vmatpush1.bf16.msra.mxu0 %v1634_v39  ;;  %v104_v39 = vrot.slane %v1985_v59, %v103_v34  ;;  %v1712_v59 = vld [vmem:[#allocation8 + $0x274] ss:$12 sps:$4 sm:$0xff]  }
  0x7b   :  { %906 = vmatprep.subr.bf16.mxu0 %v1641_v40  ;;  %v1689_v40 = vld [vmem:[#allocation8 + $0x1f8] ss:$12 sps:$4 sm:$0xff]  }
  0x7e   :  { %907 = vmatpush1.bf16.msra.mxu0 %v1639_v41  ;;  %v1693_v41 = vld [vmem:[#allocation8 + $0x200] ss:$12 sps:$4 sm:$0xff]  }
  0x7f   :  { %908 = vmatprep.subr.bf16.mxu0 %v1646_v42  ;;  %v1696_v42 = vld [vmem:[#allocation8 + $0x214] ss:$12 sps:$4 sm:$0xff]  }
  0x82   :  { %909 = vmatpush1.bf16.msra.mxu0 %v1644_v43  ;;  %v1697_v43 = vld [vmem:[#allocation8 + $0x2d8] ss:$12 sps:$4 sm:$0xff]  }
  0x83   :  { %910 = vmatprep.subr.bf16.mxu0 %v1651_v44 }
  0x86   :  { %911 = vmatpush1.bf16.msra.mxu0 %v1649_v45  ;;  %v1694_v45 = vld [vmem:[#allocation8 + $0x210] ss:$12 sps:$4 sm:$0xff]  }
  0x87   :  { %912 = vmatprep.subr.bf16.mxu0 %v1656_v46  ;;  %v1698_v46 = vld [vmem:[#allocation8 + $0x218] ss:$12 sps:$4 sm:$0xff]  }
  0x8a   :  { %913 = vmatpush1.bf16.msra.mxu0 %v1654_v48  ;;  %v1702_v48 = vld [vmem:[#allocation8 + $0x2f0] ss:$12 sps:$4 sm:$0xff]  }
  0x8b   :  { %914 = vmatprep.subr.bf16.mxu0 %v1661_v50  ;;  %v1699_v50 = vld [vmem:[#allocation8 + $0x228] ss:$12 sps:$4 sm:$0xff]  }
  0x8e   :  { %915 = vmatpush1.bf16.msra.mxu0 %v1659_v52  ;;  %v1706_v52 = vld [vmem:[#allocation8 + $0x244] ss:$12 sps:$4 sm:$0xff]  }
  0x8f   :  { %925 = vmatprep.subr.bf16.mxu0 %v1666_v54  ;;  %v1704_v54 = vld [vmem:[#allocation8 + $0x240] ss:$12 sps:$4 sm:$0xff]  }
 0x124   :  { %v171_v0 = vpop.f32.mrb[0].mxu0 }
 0x125   :  { %v172_v2 = vadd.f32 %v171_v0, %v96_v62  ;;  %v173_v3 = vpop.f32.mrb[1].mxu0  ;;  %v1996_v6 = vpop.f32.mrb[0].mxu1  ;;  %v1715_v62 = vld [vmem:[#allocation8 + $0x28c] ss:$12 sps:$4 sm:$0xff]   ;;  %v1718_v0 = vld [vmem:[#allocation8 + $0x2a4] ss:$12 sps:$4 sm:$0xff]  }
 0x126   :  { %v174_v4 = vadd.f32 %v173_v3, %v100_v63  ;;  %v175_v5 = vpop.f32.mrb[2].mxu0  ;;  %v214_v9 = vpop.f32.mrb[1].mxu1  ;;  %v213_v44 = vadd.f32 %v1996_v6, %v104_v39  ;;  %v1713_v63 = vld [vmem:[#allocation8 + $0x288] ss:$12 sps:$4 sm:$0xff]   ;;  %v1719_v3 = vld [vmem:[#allocation8 + $0x2b8] ss:$12 sps:$4 sm:$0xff]  }
 0x127   :  { %v219_v7 = vmax.f32 %v172_v2, 0.0  ;;  %v176_v8 = vpop.f32.mrb[3].mxu0  ;;  %v215_v11 = vadd.f32 %v214_v9, %v108_v1  ;;  %v216_v12 = vpop.f32.mrb[2].mxu1  ;;  %v1716_v1 = vld [vmem:[#allocation8 + $0x2a0] ss:$12 sps:$4 sm:$0xff]  }
 0x128   :  { %v220_v10 = vmax.f32 %v174_v4, 0.0  ;;  %v217_v13 = vpop.f32.mrb[3].mxu1  ;;  %v221_v49 = vmax.f32 %v213_v44, 0.0  ;;  %v1721_v2 = vld [vmem:[#allocation8 + $0x2bc] ss:$12 sps:$4 sm:$0xff]   ;;  %v1728_v8 = vld [vmem:[#allocation9 + $0x40] sm:$0xff]  }
 0x129   :  { %v222_v17 = vmax.f32 %v215_v11, 0.0  ;;  %v223_v18 = vpack.c.bf16 %v219_v7, %v219_v7  ;;  %v1724_v4 = vld [vmem:[#allocation8 + $0x2d4] ss:$12 sps:$4 sm:$0xff]   ;;  %v1722_v5 = vld [vmem:[#allocation8 + $0x2d0] ss:$12 sps:$4 sm:$0xff]   ;;  %v1731_v11 = vld [vmem:[#allocation9 + $0x8] sm:$0xff]  }
 0x12a   :  { %v224_v14 = vpack.c.bf16 %v220_v10, %v220_v10  ;;  %v225_v53 = vpack.c.bf16 %v221_v49, %v221_v49  ;;  %v1727_v6 = vld [vmem:[#allocation8 + $0x2ec] ss:$12 sps:$4 sm:$0xff]   ;;  %v1725_v7 = vld [vmem:[#allocation8 + $0x2e8] ss:$12 sps:$4 sm:$0xff]   ;;  %v1729_v9 = vld [vmem:[#allocation9] sm:$0xff]  }
 0x12b   :  { %v226_v21 = vpack.c.bf16 %v222_v17, %v222_v17  ;;  %v1730_v10 = vld [vmem:[#allocation9 + $0x48] sm:$0xff]   ;;  %v1732_v12 = vld [vmem:[#allocation9 + $0x50] sm:$0xff]   ;;  %v1737_v17 = vld [vmem:[#allocation9 + $0x20] sm:$0xff]  }
 0x12c   :  { %916 = vmatprep.mubr.bf16.mxu0 %v224_v14  ;;  %998 = vmatprep.mubr.bf16.mxu1 %v224_v14  ;;  %v1733_v13 = vld [vmem:[#allocation9 + $0x10] sm:$0xff]   ;;  %v1734_v14 = vld [vmem:[#allocation9 + $0x58] sm:$0xff]  }
 0x12d   :  { %917 = vmatmul.mubr.bf16.vlgmr.msra.gmra.mrb[4].mxu0 %v223_v18  ;;  %999 = vmatmul.mubr.bf16.vlgmr.msra.gmra.mrb[4].mxu1 %v223_v18  ;;  %v1738_v18 = vld [vmem:[#allocation9 + $0x68] sm:$0xff]  }
 0x12e   :  { %926 = vmatpush1.bf16.msra.mxu0 %v1664_v15  ;;  %1502 = vmatpush3.bf16.msra.mxu1 %v1668_v16  ;;  %v1735_v15 = vld [vmem:[#allocation9 + $0x18] sm:$0xff]   ;;  %v1736_v16 = vld [vmem:[#allocation9 + $0x60] sm:$0xff]  }
 0x12f   :  { %927 = vmatprep.subr.bf16.mxu0 %v1671_v19  ;;  %1503 = vmatprep.subr.bf16.mxu1 %v1672_v20  ;;  %v1739_v19 = vld [vmem:[#allocation9 + $0x28] sm:$0xff]   ;;  %v1740_v20 = vld [vmem:[#allocation9 + $0x70] sm:$0xff]  }
 0x130   :  { %1038 = vmatprep.mubr.bf16.mxu1 %v226_v21  ;;  %957 = vmatprep.mubr.bf16.mxu0 %v226_v21  ;;  %v1741_v21 = vld [vmem:[#allocation9 + $0x30] sm:$0xff]  }
 0x132   :  { %928 = vmatpush1.bf16.msra.mxu0 %v1669_v22  ;;  %1504 = vmatpush3.bf16.msra.mxu1 %v1673_v23  ;;  %v1742_v22 = vld [vmem:[#allocation9 + $0x78] sm:$0xff]  }
 0x133   :  { %929 = vmatprep.subr.bf16.mxu0 %v1676_v24  ;;  %1505 = vmatprep.subr.bf16.mxu1 %v1677_v25  ;;  %v1743_v23 = vld [vmem:[#allocation9 + $0x38] sm:$0xff]   ;;  %v1883_v24 = vmov 0.0  }
 0x136   :  { %930 = vmatpush1.bf16.msra.mxu0 %v1674_v26  ;;  %1506 = vmatpush3.bf16.msra.mxu1 %v1678_v27 }
 0x137   :  { %931 = vmatprep.subr.bf16.mxu0 %v1681_v28  ;;  %1507 = vmatprep.subr.bf16.mxu1 %v1682_v29 }
 0x13a   :  { %932 = vmatpush1.bf16.msra.mxu0 %v1679_v30  ;;  %1508 = vmatpush3.bf16.msra.mxu1 %v1683_v31  ;;  %v355_v30 = vld [vmem:[%s2035_s5] sm:$0x7] }
 0x13b   :  { %933 = vmatprep.subr.bf16.mxu0 %v1686_v32  ;;  %1509 = vmatprep.subr.bf16.mxu1 %v1687_v33  ;;  %v368_v31 = vrot.slane %v355_v30, %v103_v34 }
 0x13e   :  { %934 = vmatpush1.bf16.msra.mxu0 %v1684_v35  ;;  %1510 = vmatpush3.bf16.msra.mxu1 %v1688_v36 }
 0x13f   :  { %935 = vmatprep.subr.bf16.mxu0 %v1691_v37  ;;  %1511 = vmatprep.subr.bf16.mxu1 %v1692_v38 }
 0x142   :  { %936 = vmatpush1.bf16.msra.mxu0 %v1689_v40  ;;  %1512 = vmatpush3.bf16.msra.mxu1 %v1693_v41  ;;  %v360_v40 = vrot.slane %v355_v30, %v95_v58  ;;  %v364_v41 = vrot.slane %v355_v30, %v99_v60  ;;  %v1747_v58 = vld [vmem:[#allocation9 + $0x98] sm:$0xff]   ;;  %v1748_v60 = vld [vmem:[#allocation9 + $0xa0] sm:$0xff]  }
 0x143   :  { %937 = vmatprep.subr.bf16.mxu0 %v1696_v42  ;;  %1513 = vmatprep.subr.bf16.mxu1 %v1697_v43 }
 0x146   :  { %938 = vmatpush1.bf16.msra.mxu0 %v1694_v45  ;;  %1514 = vmatpush3.bf16.msra.mxu1 %v1698_v46 }
 0x147   :  { %939 = vmatprep.subr.bf16.mxu0 %v1701_v47  ;;  %1515 = vmatprep.subr.bf16.mxu1 %v1702_v48 }
 0x14a   :  { %940 = vmatpush1.bf16.msra.mxu0 %v1699_v50  ;;  %1516 = vmatpush3.bf16.msra.mxu1 %v1703_v51  ;;  %v1744_v50 = vld [vmem:[#allocation9 + $0x80] sm:$0xff]  }
 0x14b   :  { %941 = vmatprep.subr.bf16.mxu0 %v1706_v52  ;;  %1523 = vmatprep.subr.bf16.mxu1 %v1728_v8  ;;  %v1745_v52 = vld [vmem:[#allocation9 + $0x88] sm:$0xff]  }
 0x14d   :  { %1039 = vmatmul.mubr.bf16.vlgmr.msra.gmra.mrb[8].mxu1 %v225_v53 }
 0x14e   :  { %942 = vmatpush1.bf16.msra.mxu0 %v1704_v54  ;;  %1524 = vmatpush3.bf16.msra.mxu1 %v1729_v9  ;;  %v1750_v54 = vld [vmem:[#allocation9 + $0xb0] sm:$0xff]   ;;  %v1332_v9 = vstv %s2030_s0 }
 0x14f   :  { %943 = vmatprep.subr.bf16.mxu0 %v1709_v55  ;;  %1525 = vmatprep.subr.bf16.mxu1 %v1730_v10  ;;  %v1751_v55 = vld [vmem:[#allocation9 + $0xb8] sm:$0xff]  }
 0x152   :  { %944 = vmatpush1.bf16.msra.mxu0 %v1707_v56  ;;  %1526 = vmatpush3.bf16.msra.mxu1 %v1731_v11 }
 0x153   :  { %945 = vmatprep.subr.bf16.mxu0 %v1712_v59  ;;  %1527 = vmatprep.subr.bf16.mxu1 %v1732_v12 }
 0x156   :  { %946 = vmatpush1.bf16.msra.mxu0 %v1710_v61  ;;  %1528 = vmatpush3.bf16.msra.mxu1 %v1733_v13 }
 0x157   :  { %947 = vmatprep.subr.bf16.mxu0 %v1715_v62  ;;  %1529 = vmatprep.subr.bf16.mxu1 %v1734_v14 }
 0x15a   :  { %948 = vmatpush1.bf16.msra.mxu0 %v1713_v63  ;;  %1530 = vmatpush3.bf16.msra.mxu1 %v1735_v15 }
 0x15b   :  { %949 = vmatprep.subr.bf16.mxu0 %v1718_v0  ;;  %1531 = vmatprep.subr.bf16.mxu1 %v1736_v16 }
 0x15e   :  { %950 = vmatpush1.bf16.msra.mxu0 %v1716_v1  ;;  %1532 = vmatpush3.bf16.msra.mxu1 %v1737_v17 }
 0x15f   :  { %951 = vmatprep.subr.bf16.mxu0 %v1721_v2  ;;  %1533 = vmatprep.subr.bf16.mxu1 %v1738_v18  ;;  %v1454_v2 = vld [vmem:[%s2037_s7] ss:$0 sm:$0xff] }
 0x162   :  { %952 = vmatpush1.bf16.msra.mxu0 %v1719_v3  ;;  %1534 = vmatpush3.bf16.msra.mxu1 %v1739_v19 }
 0x163   :  { %953 = vmatprep.subr.bf16.mxu0 %v1724_v4  ;;  %1535 = vmatprep.subr.bf16.mxu1 %v1740_v20 }
 0x166   :  { %954 = vmatpush1.bf16.msra.mxu0 %v1722_v5  ;;  %1536 = vmatpush3.bf16.msra.mxu1 %v1741_v21 }
 0x167   :  { %955 = vmatprep.subr.bf16.mxu0 %v1727_v6  ;;  %1537 = vmatprep.subr.bf16.mxu1 %v1742_v22 }
 0x16a   :  { %956 = vmatpush1.bf16.msra.mxu0 %v1725_v7  ;;  %1538 = vmatpush3.bf16.msra.mxu1 %v1743_v23 }
 0x16b   :  { %1554 = vmatprep.subr.bf16.mxu1 %v1883_v24 }
 0x16d   :  { %958 = vmatmul.mubr.bf16.vlgmr.msra.gmra.mrb[4].mxu0 %v225_v53  ;;  %v1749_v53 = vld [vmem:[#allocation9 + $0xa8] sm:$0xff]  }
 0x200   :  { %v1495_v25 = vpop.f32.mrb[4].mxu1 }
 0x201   :  { %v1496_v26 = vpop.f32.mrb[5].mxu1 }
 0x202   :  { %v1497_v27 = vadd.f32 %v1496_v26, %v1495_v25  ;;  %v1498_v28 = vpop.f32.mrb[6].mxu1 }
 0x203   :  { %v1499_v29 = vpop.f32.mrb[7].mxu1 }
 0x204   :  { %v1001_v35 = vadd.f32 %v1497_v27, %v368_v31 }
 0x220   :  { %v1517_v32 = vpop.f32.mrb[8].mxu1 }
 0x221   :  { %v1518_v33 = vpop.f32.mrb[9].mxu1 }
 0x222   :  { %v1519_v36 = vadd.f32 %v1518_v33, %v1517_v32  ;;  %v1520_v37 = vpop.f32.mrb[10].mxu1 }
 0x223   :  { %v1521_v38 = vpop.f32.mrb[11].mxu1 }
 0x224   :  { %v1041_v39 = vadd.f32 %v1519_v36, %v1001_v35 }
 0x226   :  { %v1048_v56 = vmax.f32 %v1041_v39, 0.0 }
 0x228   :  { %v1051_v59 = vpack.c.bf16 %v1048_v56, %v1048_v56 }
 0x240   :  { %v959_v42 = vpop.f32.mrb[4].mxu0 }
 0x241   :  { %v1574_v43 = vadd.f32 %v959_v42, %v360_v40  ;;  %v961_v44 = vpop.f32.mrb[5].mxu0 }
 0x242   :  { %v1575_v45 = vadd.f32 %v961_v44, %v364_v41  ;;  %v963_v46 = vpop.f32.mrb[6].mxu0 }
 0x243   :  { %v1046_v47 = vmax.f32 %v1574_v43, 0.0  ;;  %v964_v34 = vpop.f32.mrb[7].mxu0 }
 0x244   :  { %v1047_v48 = vmax.f32 %v1575_v45, 0.0 }
 0x245   :  { %v1049_v51 = vpack.c.bf16 %v1046_v47, %v1046_v47 }
 0x246   :  { %v1050_v49 = vpack.c.bf16 %v1047_v48, %v1047_v48 }
 0x248   :  { %1283 = vmatprep.mubr.bf16.mxu1 %v1050_v49 }
 0x249   :  { %1284 = vmatmul.mubr.bf16.vlgmr.msra.gmra.mrb[12].mxu1 %v1049_v51 }
 0x24a   :  { %1555 = vmatpush3.bf16.msra.mxu1 %v1744_v50  ;;  %1570 = vmatprep.mubr.msk.bf16.mxu1 %vm1884_vm1, %v1883_v24 }
 0x24b   :  { %1556 = vmatprep.subr.bf16.mxu1 %v1883_v24 }
 0x24e   :  { %1557 = vmatpush3.bf16.msra.mxu1 %v1745_v52 }
 0x24f   :  { %1558 = vmatprep.subr.bf16.mxu1 %v1883_v24 }
 0x252   :  { %1559 = vmatpush3.bf16.msra.mxu1 %v1746_v57 }
 0x253   :  { %1560 = vmatprep.subr.bf16.mxu1 %v1883_v24 }
 0x256   :  { %1561 = vmatpush3.bf16.msra.mxu1 %v1747_v58 }
 0x257   :  { %1562 = vmatprep.subr.bf16.mxu1 %v1883_v24 }
 0x25a   :  { %1563 = vmatpush3.bf16.msra.mxu1 %v1748_v60 }
 0x25b   :  { %1564 = vmatprep.subr.bf16.mxu1 %v1883_v24 }
 0x25e   :  { %1565 = vmatpush3.bf16.msra.mxu1 %v1749_v53 }
 0x25f   :  { %1566 = vmatprep.subr.bf16.mxu1 %v1883_v24 }
 0x262   :  { %1567 = vmatpush3.bf16.msra.mxu1 %v1750_v54 }
 0x263   :  { %1568 = vmatprep.subr.bf16.mxu1 %v1883_v24 }
 0x266   :  { %1569 = vmatpush3.bf16.msra.mxu1 %v1751_v55 }
 0x269   :  { %1571 = vmatmul.mubr.bf16.vlgmr.msra.gmra.mrb[16].mxu1 %v1051_v59 }
 0x31c   :  { %v1539_v61 = vpop.f32.mrb[12].mxu1 }
 0x31d   :  { %v1540_v62 = vpop.f32.mrb[13].mxu1 }
 0x31e   :  { %v1541_v63 = vadd.f32 %v1540_v62, %v1539_v61  ;;  %v1542_v0 = vpop.f32.mrb[14].mxu1 }
 0x31f   :  { %v1543_v1 = vpop.f32.mrb[15].mxu1 }
 0x320   :  { %v1286_v3 = vadd.f32 %v1541_v63, %v1454_v2 }
 0x33c   :  { %v1325_v4 = vpop.f32.mrb[16].mxu1 }
 0x33d   :  { %v1326_v5 = vadd.f32 %v1325_v4, %v1286_v3  ;;  %v1572_v6 = vpop.f32.mrb[17].mxu1 }
 0x33e   :  { %v1328_v7 = vpop.f32.mrb[18].mxu1 }
 0x33f   :  { %1752 = vtanh.f32 %v1326_v5  ;;  %v1573_v8 = vpop.f32.mrb[19].mxu1 }
 0x349   :  { %v1753_v10 = vpop.eup %1752 }
 0x34a   :  { %v1333_v11 = vmul.f32 %v1753_v10, %v1332_v9 }
 0x34c   :  { %1334 = vst [vmem:[#allocation11] sm:$0xff] %v1333_v11 }
 0x34d   :  { %1853 = shalt.err (!%p1850_p8)
}
 0x34e   :  { %s1854_s19 = scalar_lea.hbm %s2038_s8, 128 }
 0x34f   :  { %p1855_p9 = scmp.ne.s32.totalorder %s2038_s8, %s1854_s19  ;;  %p1858_p10 = scmp.lt.u32.totalorder %s1854_s19, %s2038_s8 }
 0x351   :  { %p1860_p11 = pnand %p1858_p10, %p1855_p9 }
 0x353   :  { %1863 = shalt.err (!%p1860_p11)
}
 0x354   :  { %1344 = dma.vmem_to_hbm [thread:$0]  %s1342_s17, 128, %s2038_s8, [#allocation5]  }
 0x355   :  { %1870 = dma.done.wait [#allocation5], 128  }
 0x356   :  { %1871 = vsyncadd [#allocation5], 4294967168 }
 0x357   :  { %1348 = vsyncpa [#allocation4], 1 }
 0x358   :  { %1349 = vsyncpa [#allocation7], 1 }
 0x359   :  { %1350 = vsyncpa [#allocation10], 1 }
 0x35a   :  { %1351 = vsyncpa [#allocation5], 1 }

</bundles_post_ra>
